<compile_context>
chip_gen: v5e
topology: v5e:2x2
jax: 0.10.0
libtpu: 0.0.40
codegen_flags: <defaults>
</compile_context>

<pallas_src>
import functools

import jax
import jax.numpy as jnp
from jax import lax
from jax.experimental import pallas as pl
from jax.experimental.pallas import tpu as pltpu

LANES = 128
CHUNK_ROWS = 128              # 128 x 128 x 4B = 16 f32 vregs per live intermediate
DEFAULT_MAX_ROW_TILE = 2048   # 1 MiB per f32 input block (v5e / v6e)
V7X_MAX_ROW_TILE = 4096       # 2 MiB per f32 input block (v7x, 3.2 TB/s HBM)


def _device_kind() -> str:
    try:
        return jax.devices()[0].device_kind.lower().replace(" ", "")
    except Exception:
        return ""


def _is_v7(kind: str) -> bool:
    return ("v7" in kind) or ("tpu7" in kind)


def _multi_tensorcore(kind: str) -> bool:
    # Chips whose single JAX device spans 2 TensorCores (v4/v5p megacore, v7x).
    return any(tag in kind for tag in ("v4", "v5p", "v7", "tpu7"))


def _focal_kernel(*refs, alpha, gamma, size, row_tile, chunk, bpc, nblocks,
                  has_mask, needs_mask, fast_pt):
    if has_mask:
        x_ref, t_ref, m_ref, o_ref = refs
    else:
        x_ref, t_ref, o_ref = refs
        m_ref = None

    c = pl.program_id(0)          # "parallel" per-TensorCore axis
    i = pl.program_id(1)          # "arbitrary" reduction axis
    gb = c * bpc + i              # logical (unclamped) block index

    @pl.when(i == 0)
    def _init():
        o_ref[...] = jnp.zeros_like(o_ref)

    n_chunks = row_tile // chunk
    full_rows = size // LANES
    rem_lanes = size % LANES

    def chunk_partial(s, masked):
        start = s * chunk
        if not isinstance(start, int):
            start = pl.multiple_of(start, chunk)

        p = x_ref[pl.ds(start, chunk), :].astype(jnp.float32)
        t = t_ref[pl.ds(start, chunk), :].astype(jnp.float32)

        # F.binary_cross_entropy(reduction='none') with PyTorch's log clamp.
        log_p = jnp.maximum(jnp.log(p), -100.0)
        log_1mp = jnp.maximum(jnp.log(1.0 - p), -100.0)
        bce = -(t * log_p + (1.0 - t) * log_1mp)
        if has_mask:
            bce = m_ref[pl.ds(start, chunk), :].astype(jnp.float32) * bce

        if alpha > 1.0:
            if fast_pt:
                # binary targets, no mask: exp(-bce) == t*p + (1-t)*(1-p)
                pt = t * p + (1.0 - t) * (1.0 - p)
            else:
                pt = jnp.exp(-bce)
            d = 1.0 - pt
            if isinstance(gamma, int) and 0 <= gamma <= 8:
                # repeated multiply -> keeps pow (exp+log) off the EUP
                ff = jnp.ones_like(d) if gamma == 0 else d
                for _ in range(max(gamma - 1, 0)):
                    ff = ff * d
            else:
                ff = d ** gamma
            w = t * (alpha - 1.0) + 1.0
            pix = w * ff * bce
        else:
            pix = bce

        if masked:
            # Row/lane validity: zeroes the sub-128 tail, the partial last
            # block and the clamped duplicate block (gb >= nblocks => nothing
            # valid).  Select also kills NaN/Inf garbage from OOB rows.
            row = (lax.broadcasted_iota(jnp.int32, pix.shape, 0)
                   + (gb * row_tile + start))
            lane = lax.broadcasted_iota(jnp.int32, pix.shape, 1)
            valid = (row < full_rows) | ((row == full_rows) & (lane < rem_lanes))
            pix = jnp.where(valid, pix, 0.0)

        # (chunk,128) -> (chunk//8, 8, 128) -> pure VALU adds into one vreg.
        return pix.reshape(-1, 8, LANES).sum(axis=0)

    def block_sum(masked):
        if n_chunks == 1:
            return chunk_partial(0, masked)
        return lax.fori_loop(
            0, n_chunks,
            lambda s, acc: acc + chunk_partial(s, masked),
            jnp.zeros((8, LANES), jnp.float32),
            unroll=2)

    if not needs_mask:
        o_ref[...] += block_sum(False)
    elif nblocks == 1:
        o_ref[...] += block_sum(True)
    else:
        is_tail = gb >= nblocks - 1

        @pl.when(is_tail)
        def _tail():
            o_ref[...] += block_sum(True)

        @pl.when(jnp.logical_not(is_tail))
        def _steady():
            o_ref[...] += block_sum(False)


def focal_loss(inputs, target, mask=None, *, alpha=1.0, gamma=2,
               assume_binary_target=False, max_row_tile=None):
    """Mean focal loss matching FocalLoss.forward semantics.

    Pass `mask` in its narrowest dtype (bool / int8) — it is streamed in its
    native dtype and cast to f32 on-chip, so a {0,1} mask costs 4x less HBM
    bandwidth than an f32 one.  `assume_binary_target=True` (only used when
    mask is None and alpha > 1) computes pt = t*p + (1-t)*(1-p) directly
    instead of exp(-bce), saving one EUP transcendental per element.
    """
    assert inputs.shape == target.shape
    size = int(inputs.size)
    assert size > 0

    kind = _device_kind()
    if max_row_tile is None:
        max_row_tile = V7X_MAX_ROW_TILE if _is_v7(kind) else DEFAULT_MAX_ROW_TILE
    assert max_row_tile % CHUNK_ROWS == 0

    # Keep native dtypes; the kernel casts to f32 on-chip.
    arrays = [inputs.reshape(-1), target.reshape(-1)]
    has_mask = mask is not None
    if has_mask:
        assert mask.shape == inputs.shape
        arrays.append(mask.reshape(-1))

    # Lane-dense 2-D slab (at least one full (8,128) vreg tile of rows); only
    # the tiny tail is host-padded, the rest of the raggedness is in-kernel.
    rows = max(-(-size // LANES), 8)
    padded = rows * LANES
    if padded != size:
        arrays = [jnp.pad(a, (0, padded - size)) for a in arrays]
    arrays = [a.reshape(rows, LANES) for a in arrays]

    if rows >= CHUNK_ROWS:
        row_tile = min(max_row_tile, (rows // CHUNK_ROWS) * CHUNK_ROWS)
        chunk = CHUNK_ROWS
    else:
        # Tiny slab: one chunk == the whole block.  Narrow dtypes would need
        # 16/32-sublane tiles at these sizes, so upcast them (negligible cost).
        row_tile = max(8, (rows // 8) * 8)
        chunk = row_tile
        arrays = [a.astype(jnp.float32) if a.dtype.itemsize < 4 else a
                  for a in arrays]
    nblocks = -(-rows // row_tile)

    # One resident accumulator slab per TensorCore, only on dual-TC chips.
    ncores = 2 if (_multi_tensorcore(kind) and nblocks >= 2) else 1
    bpc = -(-nblocks // ncores)              # blocks per core
    needs_clamp = ncores * bpc > nblocks     # at most one duplicated slot
    needs_mask = ncores * bpc * row_tile * LANES != size

    if needs_clamp:
        def in_map(c, i):
            return (jnp.minimum(c * bpc + i, nblocks - 1), 0)
    else:
        def in_map(c, i):
            return (c * bpc + i, 0)

    in_specs = [pl.BlockSpec((row_tile, LANES), in_map)] * len(arrays)
    out_spec = pl.BlockSpec((8, LANES), lambda c, i: (c, 0))

    fast_pt = bool(assume_binary_target) and (not has_mask) and float(alpha) > 1.0

    kernel = functools.partial(
        _focal_kernel,
        alpha=float(alpha), gamma=gamma, size=size,
        row_tile=row_tile, chunk=chunk, bpc=bpc, nblocks=nblocks,
        has_mask=has_mask, needs_mask=needs_mask, fast_pt=fast_pt)

    # Scoped VMEM: double-buffered input streams + tiny output slab + headroom;
    # always well under v7x's 64 MiB physical VMEM.
    in_bytes = sum(2 * row_tile * LANES * a.dtype.itemsize for a in arrays)
    vmem_limit = int(min(in_bytes + (16 << 20), 56 << 20))

    partials = pl.pallas_call(
        kernel,
        out_shape=jax.ShapeDtypeStruct((ncores * 8, LANES), jnp.float32),
        grid_spec=pltpu.PrefetchScalarGridSpec(
            num_scalar_prefetch=0,
            grid=(ncores, bpc),
            in_specs=in_specs,
            out_specs=out_spec,
        ),
        compiler_params=pltpu.CompilerParams(
            # TODO(synk): verify from the Mosaic dump that the leading
            # "parallel" axis really shards across the two v7x TensorCores; if
            # not, switch to pltpu.CORE_PARALLEL / pl.core_map.
            dimension_semantics=("parallel", "arbitrary"),
            vmem_limit_bytes=vmem_limit),
    )(*arrays)

    return jnp.sum(partials) / jnp.float32(size)


def _reference(inputs, target, mask=None, *, alpha=1.0, gamma=2):
    p = inputs.astype(jnp.float32)
    t = target.astype(jnp.float32)
    bce = -(t * jnp.maximum(jnp.log(p), -100.0)
            + (1.0 - t) * jnp.maximum(jnp.log(1.0 - p), -100.0))
    if mask is not None:
        bce = mask.astype(jnp.float32) * bce
    if alpha > 1.0:
        pt = jnp.exp(-bce)
        ff = (1.0 - pt) ** gamma
        w = t * (alpha - 1.0) + 1.0
        pix = w * ff * bce
    else:
        pix = bce
    return jnp.mean(pix)


if __name__ == "__main__":
    key = jax.random.PRNGKey(0)
    k1, k2, k3 = jax.random.split(key, 3)

    RTOL, ATOL = 1e-4, 1e-7

    # NCHW-like input (probabilities in (0,1), as required by binary_cross_entropy)
    shape = (2, 4, 16, 16)
    inputs = jax.nn.sigmoid(jax.random.normal(k1, shape, jnp.float32))
    target = (jax.random.uniform(k2, shape) > 0.5).astype(jnp.float32)

    # 1) default module config: alpha=1.0, gamma=2 (pixelwise loss == BCE), no mask
    loss_default = focal_loss(inputs, target, mask=None, alpha=1.0, gamma=2)
    jax.block_until_ready(loss_default)
    assert jnp.allclose(loss_default,
                        _reference(inputs, target, None, alpha=1.0, gamma=2),
                        rtol=RTOL, atol=ATOL)

    # 2) multi-block + in-kernel fori_loop chunking + tail pl.when path, with an
    #    int8 mask streamed in its native dtype (rows=260 -> row_tile=256).
    shape2 = (2, 4, 32, 130)
    k4, k5, k6 = jax.random.split(k3, 3)
    inputs2 = jax.nn.sigmoid(jax.random.normal(k4, shape2, jnp.float32))
    target2 = (jax.random.uniform(k5, shape2) > 0.5).astype(jnp.float32)
    mask2 = (jax.random.uniform(k6, shape2) > 0.25).astype(jnp.int8)
    loss_focal = focal_loss(inputs2, target2, mask=mask2, alpha=2.0, gamma=2)
    jax.block_until_ready(loss_focal)
    assert jnp.allclose(loss_focal,
                        _reference(inputs2, target2, mask2, alpha=2.0, gamma=2),
                        rtol=RTOL, atol=ATOL)

    # 3) odd total size (not a multiple of 128): sub-128 tail + partial block.
    shape3 = (2, 3, 15, 17)
    k7, k8 = jax.random.split(k6)
    inputs3 = jax.nn.sigmoid(jax.random.normal(k7, shape3, jnp.float32))
    target3 = (jax.random.uniform(k8, shape3) > 0.5).astype(jnp.float32)
    loss3 = focal_loss(inputs3, target3, alpha=2.0, gamma=2)
    jax.block_until_ready(loss3)
    assert jnp.allclose(loss3,
                        _reference(inputs3, target3, None, alpha=2.0, gamma=2),
                        rtol=RTOL, atol=ATOL)

    # 4) binary-target fast path (pt computed without exp): same result up to fp.
    loss_fast = focal_loss(inputs, target, mask=None, alpha=2.0, gamma=2,
                           assume_binary_target=True)
    jax.block_until_ready(loss_fast)
    assert jnp.allclose(loss_fast,
                        _reference(inputs, target, None, alpha=2.0, gamma=2),
                        rtol=RTOL, atol=ATOL)

    print("KERNEL_OK")
</pallas_src>

<mosaic_0001>
module attributes {stable_mosaic.version = 11 : i64} {
  func.func @_focal_kernel(%arg0: i32, %arg1: i32, %arg2: memref<16x128xf32, #tpu.memory_space<vmem>>, %arg3: memref<16x128xf32, #tpu.memory_space<vmem>>, %arg4: memref<8x128xf32, #tpu.memory_space<vmem>>) attributes {dimension_semantics = [#tpu.dimension_semantics<parallel>, #tpu.dimension_semantics<arbitrary>], iteration_bounds = array<i64: 1, 1>, scalar_prefetch = 0 : i64, scratch_operands = 0 : i64, tpu.core_type = #tpu.core_type<tc>, window_params = [{transform_indices = @transform_0, window_bounds = array<i64: 16, 128>}, {transform_indices = @transform_1, window_bounds = array<i64: 16, 128>}, {transform_indices = @transform_2, window_bounds = array<i64: 8, 128>}]} {
    %c0_i32 = arith.constant 0 : i32
    %0 = arith.cmpi eq, %arg1, %c0_i32 : i32
    %1 = arith.extui %0 : i1 to i32
    %c0_i32_0 = arith.constant 0 : i32
    %2 = arith.cmpi ne, %1, %c0_i32_0 : i32
    scf.if %2 {
      %cst_13 = arith.constant 0.000000e+00 : f32
      %25 = vector.broadcast %cst_13 : f32 to vector<8x128xf32>
      %c0_14 = arith.constant 0 : index
      %c0_15 = arith.constant 0 : index
      %26 = vector.load %arg4[%c0_14, %c0_15] : memref<8x128xf32, #tpu.memory_space<vmem>>, vector<8x128xf32>
      tpu.vector_store %arg4[%c0_14, %c0_15], %25 {strides = array<i32>} : memref<8x128xf32, #tpu.memory_space<vmem>>, vector<8x128xf32>,
    } else {
    }
    %c0 = arith.constant 0 : index
    %c0_1 = arith.constant 0 : index
    %3 = vector.load %arg4[%c0, %c0_1] : memref<8x128xf32, #tpu.memory_space<vmem>>, vector<8x128xf32>
    %c0_2 = arith.constant 0 : index
    %c0_3 = arith.constant 0 : index
    %4 = vector.load %arg2[%c0_2, %c0_3] : memref<16x128xf32, #tpu.memory_space<vmem>>, vector<16x128xf32>
    %c0_4 = arith.constant 0 : index
    %c0_5 = arith.constant 0 : index
    %5 = vector.load %arg3[%c0_4, %c0_5] : memref<16x128xf32, #tpu.memory_space<vmem>>, vector<16x128xf32>
    %6 = math.log %4 : vector<16x128xf32>
    %cst = arith.constant -1.000000e+02 : f32
    %7 = vector.broadcast %cst : f32 to vector<16x128xf32>
    %8 = arith.maximumf %6, %7 : vector<16x128xf32>
    %cst_6 = arith.constant 1.000000e+00 : f32
    %9 = vector.broadcast %cst_6 : f32 to vector<16x128xf32>
    %10 = arith.subf %9, %4 : vector<16x128xf32>
    %11 = math.log %10 : vector<16x128xf32>
    %cst_7 = arith.constant -1.000000e+02 : f32
    %12 = vector.broadcast %cst_7 : f32 to vector<16x128xf32>
    %13 = arith.maximumf %11, %12 : vector<16x128xf32>
    %14 = arith.mulf %5, %8 : vector<16x128xf32>
    %cst_8 = arith.constant 1.000000e+00 : f32
    %15 = vector.broadcast %cst_8 : f32 to vector<16x128xf32>
    %16 = arith.subf %15, %5 : vector<16x128xf32>
    %17 = arith.mulf %16, %13 : vector<16x128xf32>
    %18 = arith.addf %14, %17 : vector<16x128xf32>
    %cst_9 = arith.constant 0.000000e+00 : f32
    %19 = vector.broadcast %cst_9 : f32 to vector<16x128xf32>
    %20 = arith.subf %19, %18 : vector<16x128xf32>
    %21 = vector.shape_cast %20 : vector<16x128xf32> to vector<2x8x128xf32>
    %cst_10 = arith.constant dense<0.000000e+00> : vector<8x128xf32>
    %22 = vector.multi_reduction <add>, %21, %cst_10 [0] : vector<2x8x128xf32> to vector<8x128xf32>
    %23 = arith.addf %3, %22 : vector<8x128xf32>
    %c0_11 = arith.constant 0 : index
    %c0_12 = arith.constant 0 : index
    %24 = vector.load %arg4[%c0_11, %c0_12] : memref<8x128xf32, #tpu.memory_space<vmem>>, vector<8x128xf32>
    tpu.vector_store %arg4[%c0_11, %c0_12], %23 {strides = array<i32>} : memref<8x128xf32, #tpu.memory_space<vmem>>, vector<8x128xf32>,
    return
  }
  func.func @transform_0(%arg0: i32, %arg1: i32) -> (i32, i32) {
    %c1_i32 = arith.constant 1 : i32
    %0 = arith.muli %arg0, %c1_i32 : i32
    %1 = arith.addi %0, %arg1 : i32
    %c0_i32 = arith.constant 0 : i32
    %c0_i32_0 = arith.constant 0 : i32
    return %1, %c0_i32 : i32, i32
  }
  func.func @transform_1(%arg0: i32, %arg1: i32) -> (i32, i32) {
    %c1_i32 = arith.constant 1 : i32
    %0 = arith.muli %arg0, %c1_i32 : i32
    %1 = arith.addi %0, %arg1 : i32
    %c0_i32 = arith.constant 0 : i32
    %c0_i32_0 = arith.constant 0 : i32
    return %1, %c0_i32 : i32, i32
  }
  func.func @transform_2(%arg0: i32, %arg1: i32) -> (i32, i32) {
    %c0_i32 = arith.constant 0 : i32
    %c0_i32_0 = arith.constant 0 : i32
    return %arg0, %c0_i32 : i32, i32
  }
}

</mosaic_0001>

<bundles_post_ra>
// kernel: tpu_custom_call.1
= control target key start
LH: loop header
LB: loop body
LE: loop exit
PB: predicated region body
PF: predicated region fallthrough
CT: control target
= control target key end

     0   :  { %7 = vsyncpa [#allocation3], 0  ;;  %s232_s0 = inlined_call_operand.hbm [shape: f32[16,128], index: 0, kind: input, shape index: {}]   ;;  %s233_s1 = inlined_call_operand.hbm [shape: f32[16,128], index: 1, kind: input, shape index: {}]   ;;  %s234_s2 = inlined_call_operand.hbm [shape: f32[8,128], index: 2, kind: output, shape index: {}]  }
   0x1   :  { %8 = vsyncpa [#allocation6], 0 }
   0x2   :  { %9 = vsyncpa [#allocation4], 0  ;;  %s18_s11 = sshll.u32 %s232_s0, 4  ;;  %s203_s12 = smov [#allocation2]   ;;  %s19_s11 = int_to_ptr.hbm [resolvable:$true] %s18_s11 }
   0x3   :  { %s20_s13 = sshll.u32 %s203_s12, 4  ;;  %s35_s16 = sshll.u32 %s233_s1, 4  ;;  %s21_s13 = int_to_ptr.vmem [resolvable:$true] %s20_s13  ;;  %s36_s16 = int_to_ptr.hbm [resolvable:$true] %s35_s16 }
   0x4   :  { %s204_s17 = smov 128   ;;  %s205_s18 = smov 8  }
   0x5   :  { %26 = dma.hbm_to_vmem [thread:$0]  %s19_s11, 256, %s21_s13, [#allocation3], %s204_s17, %s204_s17, %s205_s18  }
   0x6   :  { %s206_s19 = smov [#allocation5]  }
   0x7   :  { %s37_s20 = sshll.u32 %s206_s19, 4  ;;  %s38_s20 = int_to_ptr.vmem [resolvable:$true] %s37_s20 }
   0x8   :  { %43 = dma.hbm_to_vmem [thread:$0]  %s36_s16, 256, %s38_s20, [#allocation6], %s204_s17, %s204_s17, %s205_s18  }
   0x9   :  { %197 = dma.done.wait [#allocation3], 256  }
   0xa   :  { %198 = vsyncadd [#allocation3], 4294967040 }
   0xb   :  { %199 = dma.done.wait [#allocation6], 256  }
   0xc   :  { %200 = vsyncadd [#allocation6], 4294967040  ;;  %v62_v0 = vld [vmem:[#allocation2] sm:$0xff]  ;;  %v63_v1 = vld [vmem:[#allocation2 + $0x8] sm:$0xff]  ;;  %s207_s0 = smov [#allocation7]   ;;  %s100_s23 = sshll.u32 %s234_s2, 4  ;;  %s101_s23 = int_to_ptr.hbm [resolvable:$true] %s100_s23 }
   0xd   :  { %117 = vlog2.f32 %v62_v0  ;;  %v72_v2 = vsub.f32 1.0, %v62_v0  ;;  %v73_v3 = vsub.f32 1.0, %v63_v1  ;;  %v64_v5 = vld [vmem:[#allocation5] sm:$0xff]  ;;  %v65_v7 = vld [vmem:[#allocation5 + $0x8] sm:$0xff]  ;;  %s98_s1 = sshll.u32 %s207_s0, 4  ;;  %s99_s1 = int_to_ptr.vmem [resolvable:$true] %s98_s1 }
   0xe   :  { %119 = vlog2.f32 %v63_v1  ;;  %v82_v14 = vsub.f32 1.0, %v64_v5  ;;  %v83_v17 = vsub.f32 1.0, %v65_v7 }
   0xf   :  { %121 = vlog2.f32 %v72_v2 }
  0x10   :  { %123 = vlog2.f32 %v73_v3 }
  0x13   :  { %v118_v4 = vpop.eup %117 }
  0x14   :  { %v120_v6 = vpop.eup %119  ;;  %v67_v8 = vmul.f32 0.6931472, %v118_v4 }
  0x15   :  { %v122_v9 = vpop.eup %121  ;;  %v69_v10 = vmul.f32 0.6931472, %v120_v6 }
  0x16   :  { %v124_v11 = vpop.eup %123  ;;  %v70_v12 = vmax.f32 %v67_v8, -100.0  ;;  %v75_v13 = vmul.f32 0.6931472, %v122_v9 }
  0x17   :  { %v71_v15 = vmax.f32 %v69_v10, -100.0  ;;  %v77_v16 = vmul.f32 0.6931472, %v124_v11 }
  0x18   :  { %v78_v18 = vmax.f32 %v75_v13, -100.0  ;;  %v80_v19 = vmul.f32 %v70_v12, %v64_v5 }
  0x19   :  { %v79_v20 = vmax.f32 %v77_v16, -100.0  ;;  %v81_v21 = vmul.f32 %v71_v15, %v65_v7 }
  0x1a   :  { %v84_v22 = vmul.f32 %v82_v14, %v78_v18 }
  0x1b   :  { %v85_v23 = vmul.f32 %v83_v17, %v79_v20 }
  0x1c   :  { %v86_v24 = vadd.f32 %v84_v22, %v80_v19 }
  0x1d   :  { %v87_v25 = vadd.f32 %v85_v23, %v81_v21 }
  0x1e   :  { %v88_v26 = vsub.f32 0.0, %v86_v24 }
  0x1f   :  { %v89_v27 = vsub.f32 0.0, %v87_v25 }
  0x21   :  { %v90_v28 = vadd.f32 %v89_v27, %v88_v26 }
  0x23   :  { %92 = vst [vmem:[#allocation7] sm:$0xff] %v90_v28 }
  0x24   :  { %103 = dma.vmem_to_hbm [thread:$0]  %s99_s1, 128, %s101_s23, [#allocation4]  }
  0x25   :  { %201 = dma.done.wait [#allocation4], 128  }
  0x26   :  { %202 = vsyncadd [#allocation4], 4294967168 }
  0x27   :  { %108 = vsyncpa [#allocation3], 1 }
  0x28   :  { %109 = vsyncpa [#allocation6], 1 }
  0x29   :  { %110 = vsyncpa [#allocation4], 1 }

</bundles_post_ra>
